<compile_context>
chip_gen: v7x
topology: tpu7x:2x2x1
jax: 0.10.0
libtpu: 0.0.40
codegen_flags: <defaults>
</compile_context>

<pallas_src>
import jax
import jax.numpy as jnp
from jax.experimental import pallas as pl
from jax.experimental.pallas import tpu as pltpu


def _round_up(x, m):
    return ((x + m - 1) // m) * m


def _aos_kernel(x_ref, w1_ref, b1_ref, wh_ref, bh_ref, out_ref):
    # Shared trunk: Linear + ReLU.  Dropout is identity in inference mode.
    # TODO(synk): training-mode dropout would need pltpu.prng_seed/prng_random_bits.
    h = jnp.dot(x_ref[...], w1_ref[...], preferred_element_type=jnp.float32)
    h = jnp.maximum(h + b1_ref[...], 0.0)

    # Single fused, lane-dense head matmul (sub | obj | senti | zero-pad).
    out_ref[...] = (jnp.dot(h, wh_ref[...], preferred_element_type=jnp.float32)
                    + bh_ref[...]).astype(out_ref.dtype)


def _choose_tm(M):
    # Big tiles amortize the ~0.35us/step pipeline overhead; keep >=2 grid
    # steps (when possible) so v7x's two TensorCores can both be used.
    tm = min(512, _round_up(pl.cdiv(M, 2), 8))
    return max(tm, 8)


def sequence_label_for_aos(x, params, *, tm=None):
    """x: (bs, seq_len, hidden) float32.  Returns (sub, obj, senti)."""
    bs, seq_len, hidden = x.shape
    half = hidden // 2
    tag = params["w_sub"].shape[1]

    M = bs * seq_len
    if tm is None:
        tm = _choose_tm(M)
    M_pad = _round_up(M, tm)

    x2d = x.reshape(M, hidden)
    if M_pad != M:
        x2d = jnp.pad(x2d, ((0, M_pad - M), (0, 0)))

    # ---- Fuse + lane-pad the three heads (done once, outside the kernel) ----
    n_out = 3 * tag + 1
    nf = _round_up(n_out, 128)
    w_heads = jnp.concatenate(
        [params["w_sub"], params["w_obj"], params["w_senti"]], axis=1)
    b_heads = jnp.concatenate(
        [params["b_sub"], params["b_obj"], params["b_senti"]], axis=1)
    if nf != n_out:
        w_heads = jnp.pad(w_heads, ((0, 0), (0, nf - n_out)))
        b_heads = jnp.pad(b_heads, ((0, 0), (0, nf - n_out)))

    grid = (M_pad // tm,)

    def row_map(i):
        return (i, 0)

    def rep_map(i):
        return (0, 0)

    in_specs = [
        pl.BlockSpec((tm, hidden), row_map),      # x tile
        pl.BlockSpec((hidden, half), rep_map),    # W1      (resident)
        pl.BlockSpec((1, half), rep_map),         # b1      (resident)
        pl.BlockSpec((half, nf), rep_map),        # fused head W (resident)
        pl.BlockSpec((1, nf), rep_map),           # fused head b (resident)
    ]
    out_specs = pl.BlockSpec((tm, nf), row_map)
    out_shape = jax.ShapeDtypeStruct((M_pad, nf), jnp.float32)

    # ---- Explicit VMEM budget (double-buffered x + output, resident weights)
    elt = 4
    vmem_est = (2 * tm * hidden          # x double-buffer
                + 2 * tm * nf            # output double-buffer
                + hidden * half + half   # W1 + b1
                + half * nf + nf         # fused heads
                ) * elt
    vmem_limit = int(min(48 * 1024 * 1024, max(16 * 1024 * 1024, 4 * vmem_est)))

    fused = pl.pallas_call(
        _aos_kernel,
        grid_spec=pltpu.PrefetchScalarGridSpec(
            num_scalar_prefetch=0,
            grid=grid,
            in_specs=in_specs,
            out_specs=out_specs,
        ),
        out_shape=out_shape,
        compiler_params=pltpu.CompilerParams(
            dimension_semantics=("parallel",),
            vmem_limit_bytes=vmem_limit),
    )(x2d, params["w1"], params["b1"], w_heads, b_heads)

    fused = fused[:M]
    sub = fused[:, 0:tag].reshape(bs, seq_len, tag)
    obj = fused[:, tag:2 * tag].reshape(bs, seq_len, tag)
    sen = fused[:, 2 * tag:3 * tag + 1].reshape(bs, seq_len, tag + 1)
    return sub, obj, sen


def init_params(key, hidden_size, tag_size):
    """Deterministic init mimicking nn.Linear's U(-1/sqrt(fan_in), 1/sqrt(fan_in))."""
    half = hidden_size // 2
    ks = jax.random.split(key, 8)

    def linear(kw, kb, fan_in, fan_out):
        bound = 1.0 / jnp.sqrt(jnp.float32(fan_in))
        w = jax.random.uniform(kw, (fan_in, fan_out), jnp.float32, -bound, bound)
        b = jax.random.uniform(kb, (1, fan_out), jnp.float32, -bound, bound)
        return w, b

    w1, b1 = linear(ks[0], ks[1], hidden_size, half)
    w_sub, b_sub = linear(ks[2], ks[3], half, tag_size)
    w_obj, b_obj = linear(ks[4], ks[5], half, tag_size)
    w_sen, b_sen = linear(ks[6], ks[7], half, tag_size + 1)
    return {
        "w1": w1, "b1": b1,
        "w_sub": w_sub, "b_sub": b_sub,
        "w_obj": w_obj, "b_obj": b_obj,
        "w_senti": w_sen, "b_senti": b_sen,
    }


def _reference(x, p):
    h = jnp.maximum(jnp.einsum("bsh,hk->bsk", x, p["w1"]) + p["b1"][0], 0.0)
    sub = jnp.einsum("bsk,kt->bst", h, p["w_sub"]) + p["b_sub"][0]
    obj = jnp.einsum("bsk,kt->bst", h, p["w_obj"]) + p["b_obj"][0]
    sen = jnp.einsum("bsk,kt->bst", h, p["w_senti"]) + p["b_senti"][0]
    return sub, obj, sen


if __name__ == "__main__":
    bs, seq_len, hidden, tag = 2, 8, 32, 4

    key = jax.random.PRNGKey(0)
    kx, kp = jax.random.split(key)
    x = jax.random.normal(kx, (bs, seq_len, hidden), jnp.float32)
    params = init_params(kp, hidden, tag)

    sub, obj, sen = sequence_label_for_aos(x, params)
    jax.block_until_ready((sub, obj, sen))

    # correctness check vs pure-JAX reference
    rsub, robj, rsen = _reference(x, params)
    assert sub.shape == (bs, seq_len, tag)
    assert obj.shape == (bs, seq_len, tag)
    assert sen.shape == (bs, seq_len, tag + 1)
    assert jnp.allclose(sub, rsub, atol=1e-5)
    assert jnp.allclose(obj, robj, atol=1e-5)
    assert jnp.allclose(sen, rsen, atol=1e-5)

    print("KERNEL_OK")
</pallas_src>

<mosaic_0001>
module attributes {stable_mosaic.version = 11 : i64} {
  func.func @_aos_kernel(%arg0: i32, %arg1: memref<8x32xf32, #tpu.memory_space<vmem>>, %arg2: memref<32x16xf32, #tpu.memory_space<vmem>>, %arg3: memref<1x16xf32, #tpu.memory_space<vmem>>, %arg4: memref<16x128xf32, #tpu.memory_space<vmem>>, %arg5: memref<1x128xf32, #tpu.memory_space<vmem>>, %arg6: memref<8x128xf32, #tpu.memory_space<vmem>>) attributes {dimension_semantics = [#tpu.dimension_semantics<parallel>], iteration_bounds = array<i64: 2>, scalar_prefetch = 0 : i64, scratch_operands = 0 : i64, tpu.core_type = #tpu.core_type<tc>, window_params = [{transform_indices = @transform_0, window_bounds = array<i64: 8, 32>}, {pipeline_mode = #tpu.pipeline_mode<synchronous>, transform_indices = @transform_1, window_bounds = array<i64: 32, 16>}, {pipeline_mode = #tpu.pipeline_mode<synchronous>, transform_indices = @transform_2, window_bounds = array<i64: 1, 16>}, {pipeline_mode = #tpu.pipeline_mode<synchronous>, transform_indices = @transform_3, window_bounds = array<i64: 16, 128>}, {pipeline_mode = #tpu.pipeline_mode<synchronous>, transform_indices = @transform_4, window_bounds = array<i64: 1, 128>}, {transform_indices = @transform_5, window_bounds = array<i64: 8, 128>}]} {
    %c0 = arith.constant 0 : index
    %c0_0 = arith.constant 0 : index
    %0 = vector.load %arg1[%c0, %c0_0] : memref<8x32xf32, #tpu.memory_space<vmem>>, vector<8x32xf32>
    %c0_1 = arith.constant 0 : index
    %c0_2 = arith.constant 0 : index
    %1 = vector.load %arg2[%c0_1, %c0_2] : memref<32x16xf32, #tpu.memory_space<vmem>>, vector<32x16xf32>
    %cst = arith.constant dense<0.000000e+00> : vector<8x16xf32>
    %2 = tpu.matmul %0, %1, %cst {dimension_numbers = #tpu.dot_dimension_numbers<[1], [0], [0], [1], [0, 0, 1, 1], [], []>} : vector<8x32xf32>, vector<32x16xf32>, vector<8x16xf32> -> vector<8x16xf32>
    %c0_3 = arith.constant 0 : index
    %c0_4 = arith.constant 0 : index
    %3 = vector.load %arg3[%c0_3, %c0_4] : memref<1x16xf32, #tpu.memory_space<vmem>>, vector<1x16xf32>
    %4 = vector.broadcast %3 : vector<1x16xf32> to vector<8x16xf32>
    %5 = arith.addf %2, %4 : vector<8x16xf32>
    %cst_5 = arith.constant 0.000000e+00 : f32
    %6 = vector.broadcast %cst_5 : f32 to vector<8x16xf32>
    %7 = arith.maximumf %5, %6 : vector<8x16xf32>
    %c0_6 = arith.constant 0 : index
    %c0_7 = arith.constant 0 : index
    %8 = vector.load %arg4[%c0_6, %c0_7] : memref<16x128xf32, #tpu.memory_space<vmem>>, vector<16x128xf32>
    %cst_8 = arith.constant dense<0.000000e+00> : vector<8x128xf32>
    %9 = tpu.matmul %7, %8, %cst_8 {dimension_numbers = #tpu.dot_dimension_numbers<[1], [0], [0], [1], [0, 0, 1, 1], [], []>} : vector<8x16xf32>, vector<16x128xf32>, vector<8x128xf32> -> vector<8x128xf32>
    %c0_9 = arith.constant 0 : index
    %c0_10 = arith.constant 0 : index
    %10 = vector.load %arg5[%c0_9, %c0_10] : memref<1x128xf32, #tpu.memory_space<vmem>>, vector<1x128xf32>
    %11 = vector.broadcast %10 : vector<1x128xf32> to vector<8x128xf32>
    %12 = arith.addf %9, %11 : vector<8x128xf32>
    %c0_11 = arith.constant 0 : index
    %c0_12 = arith.constant 0 : index
    %13 = vector.load %arg6[%c0_11, %c0_12] : memref<8x128xf32, #tpu.memory_space<vmem>>, vector<8x128xf32>
    tpu.vector_store %arg6[%c0_11, %c0_12], %12 {strides = array<i32>} : memref<8x128xf32, #tpu.memory_space<vmem>>, vector<8x128xf32>,
    return
  }
  func.func @transform_0(%arg0: i32) -> (i32, i32) {
    %c0_i32 = arith.constant 0 : i32
    %c0_i32_0 = arith.constant 0 : i32
    return %arg0, %c0_i32 : i32, i32
  }
  func.func @transform_1(%arg0: i32) -> (i32, i32) {
    %c0_i32 = arith.constant 0 : i32
    %c0_i32_0 = arith.constant 0 : i32
    %c0_i32_1 = arith.constant 0 : i32
    return %c0_i32, %c0_i32_0 : i32, i32
  }
  func.func @transform_2(%arg0: i32) -> (i32, i32) {
    %c0_i32 = arith.constant 0 : i32
    %c0_i32_0 = arith.constant 0 : i32
    %c0_i32_1 = arith.constant 0 : i32
    return %c0_i32, %c0_i32_0 : i32, i32
  }
  func.func @transform_3(%arg0: i32) -> (i32, i32) {
    %c0_i32 = arith.constant 0 : i32
    %c0_i32_0 = arith.constant 0 : i32
    %c0_i32_1 = arith.constant 0 : i32
    return %c0_i32, %c0_i32_0 : i32, i32
  }
  func.func @transform_4(%arg0: i32) -> (i32, i32) {
    %c0_i32 = arith.constant 0 : i32
    %c0_i32_0 = arith.constant 0 : i32
    %c0_i32_1 = arith.constant 0 : i32
    return %c0_i32, %c0_i32_0 : i32, i32
  }
  func.func @transform_5(%arg0: i32) -> (i32, i32) {
    %c0_i32 = arith.constant 0 : i32
    %c0_i32_0 = arith.constant 0 : i32
    return %arg0, %c0_i32 : i32, i32
  }
}

</mosaic_0001>

<bundles_post_ra>
// kernel: tpu_custom_call.1
= control target key start
LH: loop header
LB: loop body
LE: loop exit
PB: predicated region body
PF: predicated region fallthrough
CT: control target
= control target key end

     0   :  { %10 = vsyncpa [#allocation3], 0  ;;  %s777_s0 = inlined_call_operand.vmem [shape: f32[16,32], index: 0, kind: input, shape index: {}]   ;;  %s778_s1 = inlined_call_operand.vmem [shape: f32[32,16], index: 1, kind: input, shape index: {}]   ;;  %s779_s2 = inlined_call_operand.vmem [shape: f32[1,16], index: 2, kind: input, shape index: {}]   ;;  %s780_s3 = inlined_call_operand.vmem [shape: f32[16,128], index: 3, kind: input, shape index: {}]   ;;  %s781_s4 = inlined_call_operand.vmem [shape: f32[1,128], index: 4, kind: input, shape index: {}]   ;;  %s782_s5 = inlined_call_operand.hbm [shape: f32[16,128], index: 5, kind: output, shape index: {}]  }
   0x1   :  { %12 = vsyncpa [#allocation3 + $0x1], 0  ;;  %s653_s18 = smov 0   ;;  %s655_s19 = smov 0  }
   0x2   :  { %s657_s20 = smov 0   ;;  %s659_s21 = smov 0  }
   0x3 LB: > { %s674_s22 = sadd.s32 4294967295, %s617_s21   ;;  %s464_s23 = sadd.s32 4294967294, %s617_s21   ;;  %s617_s21 = sphi %s659_s21, %s788_s21   ;;  %s613_s20 = sphi %s657_s20, %s787_s20   ;;  %s609_s19 = sphi %s655_s19, %s786_s19   ;;  %s605_s18 = sphi %s653_s18, %s785_s18  }
   0x4   : > { %s678_s24 = sadd.s32 1, %s617_s21   ;;  %s135_s25 = sadd.s32 1, %s613_s20 }
   0x5   : > { %s132_s26 = ssub.s32 %s617_s21, %s678_s24  ;;  %p145_p0 = scmp.ne.s32.totalorder %s613_s20, %s609_s19 }
   0x6   : > { %p133_p1 = scmp.eq.s32.totalorder %s132_s26, 0  ;;  %p146_p2 = scmp.eq.s32.totalorder %s674_s22, 1 }
   0x7   : > { %p151_p3 = scmp.ne.s32.totalorder %s609_s19, %s605_s18  ;;  %p152_p4 = scmp.eq.s32.totalorder %s464_s23, 1 }
   0x8   : > { %s689_s27 = scalar_select %p133_p1, %s613_s20, %s135_s25  }
   0x9   : > { %p691_p5 = por %p146_p2, %p145_p0  ;;  %p695_p6 = por %p152_p4, %p151_p3 }
   0xa   : > { %p467_p7 = scmp.ge.s32.totalorder %s617_s21, 1  ;;  %p189_p8 = scmp.lt.s32.totalorder %s617_s21, 3 }
   0xc   : > { %p190_p9 = pnand %p467_p7, %p189_p8 }
   0xd   : > { %v221_v0 = vld [vmem:[%s778_s1] sm:$0xff] (!%p190_p9)  ;;  %v222_v1 = vld [vmem:[%s778_s1 + $0x8] sm:$0xff] (!%p190_p9)  ;;  %v223_v2 = vld [vmem:[%s778_s1 + $0x10] sm:$0xff] (!%p190_p9)  ;;  %v619_v3 = vmov (!%p190_p9), 0.0|0.0   ;;  %vm620_vm0 = vmmov (!%p190_p9), 0   ;;  %v621_v6 = vmov (!%p190_p9), 0.0  }
   0xe   : > { %193 = sbr.rel (%p190_p9) target bundleno = 470 (0x1d6), region = 40  ;;  %504 = vmatprep.subr.bf16.mxu0 (!%p190_p9), %v619_v3  ;;  %v505_v4 = vpack.c.bf16 (!%p190_p9), %v222_v1, %v221_v0  ;;  %v224_v5 = vld [vmem:[%s778_s1 + $0x18] sm:$0xff] (!%p190_p9)  ;;  %494 = vmatprep.mubr.msk.f32.mxu0 (!%p190_p9), %vm620_vm0, %v621_v6  ;;  %p216_p10 = scmp.lt.s32.totalorder (!%p190_p9), %s674_s22, 1  ;;  %vm232_vm1 = vcmask (!%p190_p9), 261120   ;;  %v307_v9 = vld [vmem:[%s780_s3] sm:$0xff] (!%p190_p9)  ;;  %v308_v10 = vld [vmem:[%s780_s3 + $0x8] sm:$0xff] (!%p190_p9) }
   0xf   : > { %510 = vmatprep.subr.bf16.mxu1 (!%p190_p9), %v619_v3  ;;  %501 = vmatprep.mubr.msk.f32.mxu1 (!%p190_p9), %vm620_vm0, %v621_v6  ;;  %v508_v7 = vpack.c.bf16 (!%p190_p9), %v224_v5, %v223_v2  ;;  %v511_v11 = vpack.c.bf16 (!%p190_p9), %v308_v10, %v307_v9  ;;  %v470_v12 = vld [vmem:[%s779_s2] ss:$0 sm:$0xff] (!%p190_p9)  ;;  %vm316_vm2 = vcmask (!%p190_p9), 130048   ;;  %s213_s8 = sand.u32 (!%p190_p9), 1, %s609_s19   ;;  %s475_s12 = sshll.u32 (!%p190_p9), %s674_s22, 7 }
  0x10   : > { %506 = vmatpush3.bf16.msra.mxu0 (!%p190_p9), %v505_v4  ;;  %s468_s9 = sshll.u32 (!%p190_p9), %s213_s8, 3  ;;  %v472_v17 = vld [vmem:[%s781_s4] ss:$0 sm:$0xff] (!%p190_p9)  ;;  %s392_s23 = scalar_lea.sflag (!%p190_p9), [#allocation3], %s213_s8 }
  0x11   : > { %507 = vmatprep.subr.bf16.mxu0 (!%p190_p9), %v619_v3  ;;  %512 = vmatpush3.bf16.msra.mxu1 (!%p190_p9), %v511_v11 }
  0x14   : > { %509 = vmatpush3.bf16.msra.mxu0 (!%p190_p9), %v508_v7 }
  0x15   : > { %s217_s13 = scalar_select %p216_p10, %s674_s22, 1 }
  0x16   : > { %s622_s22 = smov [#allocation2]  }
  0x17   : > { %s469_s14 = sshll.u32 %s217_s13, 3  ;;  %s215_s13 = scalar_lea.vmem [#allocation2], %s468_s9 }
  0x18   : > { %s219_s17 = scalar_lea.vmem %s777_s0, %s469_s14  ;;  %s405_s14 = sshll.u32 %s215_s13, 4  ;;  %s737_s14 = int_to_ptr.vmem [resolvable:$true] %s405_s14 }
  0x19   : > { %v220_v8 = vld [vmem:[%s219_s17] sm:$0xff]  ;;  %s735_s17 = scalar_lea.hbm %s782_s5, %s475_s12  ;;  %s555_s25 = scalar_lea.vmem %s737_s14, 128 }
  0x1a   : > { %495 = vmatmul.mubr.msk.f32.vlgmr.msra.gmra.mrb[0].mxu0 %vm232_vm1, %v220_v8  ;;  %p556_p11 = scmp.ne.s32.totalorder %s737_s14, %s555_s25  ;;  %s559_s26 = sshll.u32 %s622_s22, 4  ;;  %s560_s26 = int_to_ptr.vmem [resolvable:$false] %s559_s26 }
  0x1b   : > { %s561_s30 = scalar_lea.vmem %s560_s26, 256  ;;  %p562_p0 = scmp.lt.s32.totalorder %s737_s14, %s560_s26 }
  0x1c   : > { %p557_p12 = pnand %p556_p11, %p691_p5  ;;  %p563_p1 = scmp.lt.s32.totalorder %s561_s30, %s555_s25 }
  0x1e   : > { %p558_p13 = pneg %p557_p12  ;;  %p564_p2 = por %p563_p1, %p562_p0 }
  0x20   : > { %p565_p3 = pnand %p564_p2, %p558_p13 }
  0xed   : > { %v302_v13 = vpop.f32.mrb[0].mxu0 }
  0xee   : > { %v303_v14 = vadd.f32 %v470_v12, %v302_v13  ;;  %v496_v15 = vpop.f32.mrb[1].mxu0 }
  0xf0   : > { %v306_v16 = vmax.f32 %v303_v14, 0.0 }
  0xf2   : > { %502 = vmatmul.mubr.msk.f32.vlgmr.msra.gmra.mrb[0].mxu1 %vm316_vm2, %v306_v16 }
 0x1c5   : > { %v386_v18 = vpop.f32.mrb[0].mxu1 }
 0x1c6   : > { %v387_v19 = vadd.f32 %v472_v17, %v386_v18  ;;  %v503_v20 = vpop.f32.mrb[1].mxu1 }
 0x1c8   : > { %390 = vst [vmem:[%s215_s13] sm:$0xff] %v387_v19 }
 0x1c9   : > { %568 = shalt.err (!%p565_p3)
}
 0x1ca   : > { %s569_s6 = scalar_lea.hbm %s735_s17, 128  ;;  %s573_s9 = scalar_lea.hbm %s782_s5, 256 }
 0x1cb   : > { %p570_p4 = scmp.ne.s32.totalorder %s735_s17, %s569_s6  ;;  %p574_p9 = scmp.lt.u32.totalorder %s735_s17, %s782_s5 }
 0x1cc   : > { %p575_p10 = scmp.lt.u32.totalorder %s573_s9, %s569_s6  ;;  %p577_p12 = scmp.lt.u32.totalorder %s569_s6, %s735_s17 }
 0x1cd   : > { %p571_p7 = pnand %p570_p4, %p691_p5 }
 0x1ce   : > { %p576_p11 = por %p575_p10, %p574_p9 }
 0x1cf   : > { %p572_p8 = pneg %p571_p7 }
 0x1d0   : > { %p578_p13 = por %p577_p12, %p576_p11 }
 0x1d2   : > { %p579_p0 = pnand %p578_p13, %p572_p8 }
 0x1d4   : > { %582 = shalt.err (!%p579_p0)
}
 0x1d5   : > { %513 = dma.vmem_to_hbm [thread:$0]  (%p691_p5), %s737_s14, 128, %s735_s17, %s392_s23  }
 0x1d6 PF: > { %p519_p1 = scmp.ge.s32.totalorder %s617_s21, 2  ;;  %s417_s12 = sand.u32 1, %s605_s18  }
 0x1d7   : > { %s418_s13 = scalar_lea.sflag [#allocation3], %s417_s12 }
 0x1d8   : > { %p516_p2 = pnand %p519_p1, %p695_p6 }
 0x1da   : > { %600 = dma.done.wait (!%p516_p2), %s418_s13, 128  }
 0x1db   : > { %602 = vsyncadd (!%p516_p2), %s418_s13, 4294967168  ;;  %p15_p3 = scmp.ge.s32.totalorder %s678_s24, 4   ;;  %s785_s18 = smov %s609_s19 }
 0x1dc   : > { %s786_s19 = smov %s613_s20  ;;  %s787_s20 = smov %s689_s27 }
 0x1dd   : > { %s788_s21 = smov %s678_s24  ;;  %17 = sbr.rel (!%p15_p3) target bundleno = 3 (0x3), region = 75 }
 0x1e4   :  { %423 = vsyncpa [#allocation3], 1 }
 0x1e5   :  { %425 = vsyncpa [#allocation3 + $0x1], 1 }

</bundles_post_ra>
